<compile_context>
chip_gen: v6e
topology: v6e:2x2x1
jax: 0.10.0
libtpu: 0.0.40
codegen_flags: <defaults>
</compile_context>

<pallas_src>
import math
import functools

import jax
import jax.numpy as jnp
from jax.experimental import pallas as pl
from jax.experimental.pallas import tpu as pltpu


def _round_up(v, m):
    return -(-v // m) * m


def _mlp_kernel(n_layers, negative_slope, *refs):
    """Fused MLP forward for one batch tile.

    refs = (x_tile, w0, b0, w1, b1, ..., out_tile).
    Weights/biases are full arrays (VMEM-resident); only x/out are tiled.
    Weights arrive already in the matmul dtype (pre-cast in the wrapper).
    """
    x_ref = refs[0]
    out_ref = refs[-1]
    layer_refs = refs[1:-1]  # alternating (w, b)

    if 0.0 <= negative_slope <= 1.0:
        # max(h, a*h) == LeakyReLU for 0 <= a <= 1: one fewer VALU op/elem.
        leaky = lambda h: jnp.maximum(h, negative_slope * h)
    else:
        leaky = lambda h: jnp.where(h > 0, h, negative_slope * h)

    h = x_ref[...]
    for li in range(n_layers):
        w = layer_refs[2 * li][...]          # (in_i, out_i), matmul dtype
        b = layer_refs[2 * li + 1][...]      # (1, out_i), f32
        if h.dtype != w.dtype:
            h = h.astype(w.dtype)            # single cast feeding the MXU
        # MXU matmul with f32 accumulation; bias + LeakyReLU epilogue in f32.
        h = jnp.dot(h, w, preferred_element_type=jnp.float32) + b
        if li < n_layers - 1:                # LeakyReLU on all but last layer
            h = leaky(h)
    out_ref[...] = h.astype(out_ref.dtype)


def _choose_tile_b(batch, max_tile, sublane):
    """Row tile: multiple of the sublane pack, big enough to amortize the
    ~0.35us per-grid-step overhead, small enough that the batch grid has
    >=4 steps when possible (v7x megacore + pipelining) and always >=2."""
    tile = min(_round_up(batch, sublane), _round_up(max_tile, sublane))
    while tile > 128 and pl.cdiv(batch, tile) < 4:   # prefer >=4 grid steps
        tile = _round_up(tile // 2, sublane)
    while tile > 64 and pl.cdiv(batch, tile) < 2:    # insist on >=2 grid steps
        tile = _round_up(tile // 2, sublane)
    return max(sublane, tile)


def _vmem_budget_bytes(tile_b, dim_in, dim_out_pad, ws, bs,
                       x_itemsize, out_itemsize):
    # Every input spec is double-buffered, so resident weights/biases cost 2x.
    weight_bytes = 2 * sum(w.size * w.dtype.itemsize for w in ws)
    bias_bytes = 2 * sum(b.size * b.dtype.itemsize for b in bs)
    io_bytes = (2 * tile_b * dim_in * x_itemsize
                + 2 * tile_b * dim_out_pad * out_itemsize)
    widths = [dim_in] + [int(w.shape[1]) for w in ws]
    act_bytes = 2 * tile_b * max(widths) * 4         # f32 activation temps
    return weight_bytes + bias_bytes + io_bytes + act_bytes


def mlp_forward(x, weights, biases, negative_slope=0.01,
                tile_b=512, use_bf16_matmul=True):
    """x: [B, dim_in]; weights[i]: [in_i, out_i]; biases[i]: [out_i].

    bf16-on-MXU with f32 accumulation by default (native on v5e/v6e/v7x);
    pass use_bf16_matmul=False for a bit-close f32 path.
    """
    n_layers = len(weights)
    B, dim_in = x.shape
    dim_out = weights[-1].shape[1]

    compute_dtype = jnp.bfloat16 if use_bf16_matmul else jnp.float32

    # Pre-cast weights once in the wrapper: removes the per-grid-step VPU cast
    # of VMEM-resident weights and halves weight HBM->VMEM bytes / residency.
    ws = [w.astype(compute_dtype) for w in weights]
    bs = [b.astype(jnp.float32).reshape(1, -1) for b in biases]

    # Lane-dense output: pad the last layer's N to a multiple of 128 so the
    # output tile stores are full-lane (unmasked) vst; zero columns are sliced
    # off after the call.  Padded columns are essentially free on the MXU.
    dim_out_pad = _round_up(dim_out, 128)
    if dim_out_pad != dim_out:
        ws[-1] = jnp.pad(ws[-1], ((0, 0), (0, dim_out_pad - dim_out)))
        bs[-1] = jnp.pad(bs[-1], ((0, 0), (0, dim_out_pad - dim_out)))

    # Sublane pack for the streamed x/out dtype (8 f32 / 16 bf16 / 32 int8).
    sublane = max(8, 32 // jnp.dtype(x.dtype).itemsize)
    TILE_B = _choose_tile_b(B, tile_b, sublane)
    # Ragged batch: rely on Pallas boundary-block masking instead of a
    # wrapper-side jnp.pad copy of x (saves a full extra HBM pass over x).
    num_tiles = pl.cdiv(B, TILE_B)

    operands = [x]
    in_specs = [pl.BlockSpec((TILE_B, dim_in), lambda i: (i, 0))]
    for w, b in zip(ws, bs):
        operands.append(w)
        # Constant index_map: weight fetched once, stays resident across tiles.
        in_specs.append(pl.BlockSpec(w.shape, lambda i: (0, 0)))
        operands.append(b)
        in_specs.append(pl.BlockSpec(b.shape, lambda i: (0, 0)))
    out_spec = pl.BlockSpec((TILE_B, dim_out_pad), lambda i: (i, 0))

    # Explicit VMEM budget (v7x has only 64 MiB physical).
    # TODO(synk): for layer stacks whose resident weights exceed ~half of v7x
    # VMEM, fall back to tiling the hidden/output dims with an accumulator axis.
    est = _vmem_budget_bytes(TILE_B, dim_in, dim_out_pad, ws, bs,
                             jnp.dtype(x.dtype).itemsize,
                             jnp.dtype(x.dtype).itemsize)
    vmem_limit = int(min(max(1.5 * est + (4 << 20), 32 << 20), 64 << 20))

    kernel = functools.partial(_mlp_kernel, n_layers, float(negative_slope))

    out = pl.pallas_call(
        kernel,
        out_shape=jax.ShapeDtypeStruct((B, dim_out_pad), x.dtype),
        grid=(num_tiles,),
        in_specs=in_specs,
        out_specs=out_spec,
        compiler_params=pltpu.CompilerParams(
            dimension_semantics=("parallel",),   # megacore sharding on v7x
            vmem_limit_bytes=vmem_limit,
        ),
    )(*operands)

    return out[:, :dim_out] if dim_out_pad != dim_out else out


# ----------------------------------------------------------------------------
# Parameter init matching the PyTorch module (kaiming_uniform_, a=0.01,
# nonlinearity='leaky_relu'; biases zeroed).
# ----------------------------------------------------------------------------
def kaiming_uniform(key, out_features, in_features, a=0.01):
    gain = math.sqrt(2.0 / (1.0 + a * a))
    bound = gain * math.sqrt(3.0 / in_features)
    return jax.random.uniform(key, (out_features, in_features),
                              dtype=jnp.float32, minval=-bound, maxval=bound)


def init_mlp_params(key, dim_in, dim_out, n_hid_layers=1, dim_hid=128):
    dims = [dim_in] + [dim_hid] * n_hid_layers + [dim_out]
    weights, biases = [], []
    for i in range(len(dims) - 1):
        key, sub = jax.random.split(key)
        w_torch = kaiming_uniform(sub, dims[i + 1], dims[i], a=0.01)  # (out, in)
        weights.append(w_torch.T)                                     # store (in, out)
        biases.append(jnp.zeros((dims[i + 1],), jnp.float32))
    return weights, biases


def mlp_reference(x, weights, biases, negative_slope=0.01):
    h = x
    for i, (w, b) in enumerate(zip(weights, biases)):
        h = h @ w + b
        if i < len(weights) - 1:
            h = jnp.where(h > 0, h, negative_slope * h)
    return h


if __name__ == "__main__":
    key = jax.random.PRNGKey(0)
    kx, kp = jax.random.split(key)

    batch, dim_in, dim_out = 512, 32, 16
    n_hid_layers, dim_hid = 2, 128

    x = jax.random.normal(kx, (batch, dim_in), dtype=jnp.float32)
    weights, biases = init_mlp_params(kp, dim_in, dim_out, n_hid_layers, dim_hid)
    ref = mlp_reference(x, weights, biases)

    # Default bf16-on-MXU path (f32 accumulation): loose tolerance vs f32 ref.
    out_bf16 = jax.block_until_ready(mlp_forward(x, weights, biases))
    assert out_bf16.shape == (batch, dim_out)
    assert jnp.allclose(out_bf16, ref, atol=1e-1, rtol=1e-1), "mismatch (bf16 path)"

    # f32 opt-in path: bit-close to the reference.
    out_f32 = jax.block_until_ready(
        mlp_forward(x, weights, biases, use_bf16_matmul=False))
    assert jnp.allclose(out_f32, ref, atol=1e-5, rtol=1e-5), "mismatch (f32 path)"

    # Ragged batch (not a multiple of the tile): exercises masked boundary
    # block semantics -- no wrapper-side jnp.pad copy of x.
    x_odd = x[:37]
    out_odd = jax.block_until_ready(
        mlp_forward(x_odd, weights, biases, use_bf16_matmul=False))
    assert out_odd.shape == (37, dim_out)
    assert jnp.allclose(out_odd, mlp_reference(x_odd, weights, biases),
                        atol=1e-5, rtol=1e-5), "mismatch (ragged batch)"

    print("KERNEL_OK")
</pallas_src>

<mosaic_0001>
module attributes {stable_mosaic.version = 11 : i64} {
  func.func @_mlp_kernel(%arg0: i32, %arg1: memref<128x32xf32, #tpu.memory_space<vmem>>, %arg2: memref<32x128xbf16, #tpu.memory_space<vmem>>, %arg3: memref<1x128xf32, #tpu.memory_space<vmem>>, %arg4: memref<128x128xbf16, #tpu.memory_space<vmem>>, %arg5: memref<1x128xf32, #tpu.memory_space<vmem>>, %arg6: memref<128x128xbf16, #tpu.memory_space<vmem>>, %arg7: memref<1x128xf32, #tpu.memory_space<vmem>>, %arg8: memref<128x128xf32, #tpu.memory_space<vmem>>) attributes {dimension_semantics = [#tpu.dimension_semantics<parallel>], iteration_bounds = array<i64: 4>, scalar_prefetch = 0 : i64, scratch_operands = 0 : i64, tpu.core_type = #tpu.core_type<tc>, window_params = [{transform_indices = @transform_0, window_bounds = array<i64: 128, 32>}, {pipeline_mode = #tpu.pipeline_mode<synchronous>, transform_indices = @transform_1, window_bounds = array<i64: 32, 128>}, {pipeline_mode = #tpu.pipeline_mode<synchronous>, transform_indices = @transform_2, window_bounds = array<i64: 1, 128>}, {pipeline_mode = #tpu.pipeline_mode<synchronous>, transform_indices = @transform_3, window_bounds = array<i64: 128, 128>}, {pipeline_mode = #tpu.pipeline_mode<synchronous>, transform_indices = @transform_4, window_bounds = array<i64: 1, 128>}, {pipeline_mode = #tpu.pipeline_mode<synchronous>, transform_indices = @transform_5, window_bounds = array<i64: 128, 128>}, {pipeline_mode = #tpu.pipeline_mode<synchronous>, transform_indices = @transform_6, window_bounds = array<i64: 1, 128>}, {transform_indices = @transform_7, window_bounds = array<i64: 128, 128>}]} {
    %c0 = arith.constant 0 : index
    %c0_0 = arith.constant 0 : index
    %0 = vector.load %arg1[%c0, %c0_0] : memref<128x32xf32, #tpu.memory_space<vmem>>, vector<128x32xf32>
    %c0_1 = arith.constant 0 : index
    %c0_2 = arith.constant 0 : index
    %1 = vector.load %arg2[%c0_1, %c0_2] : memref<32x128xbf16, #tpu.memory_space<vmem>>, vector<32x128xbf16>
    %c0_3 = arith.constant 0 : index
    %c0_4 = arith.constant 0 : index
    %2 = vector.load %arg3[%c0_3, %c0_4] : memref<1x128xf32, #tpu.memory_space<vmem>>, vector<1x128xf32>
    %3 = arith.truncf %0 : vector<128x32xf32> to vector<128x32xbf16>
    %cst = arith.constant dense<0.000000e+00> : vector<128x128xf32>
    %4 = tpu.matmul %3, %1, %cst {dimension_numbers = #tpu.dot_dimension_numbers<[1], [0], [0], [1], [0, 0, 1, 1], [], []>} : vector<128x32xbf16>, vector<32x128xbf16>, vector<128x128xf32> -> vector<128x128xf32>
    %5 = vector.broadcast %2 : vector<1x128xf32> to vector<128x128xf32>
    %6 = arith.addf %4, %5 : vector<128x128xf32>
    %cst_5 = arith.constant 0.00999999977 : f32
    %7 = vector.broadcast %cst_5 : f32 to vector<128x128xf32>
    %8 = arith.mulf %7, %6 : vector<128x128xf32>
    %9 = arith.maximumf %6, %8 : vector<128x128xf32>
    %c0_6 = arith.constant 0 : index
    %c0_7 = arith.constant 0 : index
    %10 = vector.load %arg4[%c0_6, %c0_7] : memref<128x128xbf16, #tpu.memory_space<vmem>>, vector<128x128xbf16>
    %c0_8 = arith.constant 0 : index
    %c0_9 = arith.constant 0 : index
    %11 = vector.load %arg5[%c0_8, %c0_9] : memref<1x128xf32, #tpu.memory_space<vmem>>, vector<1x128xf32>
    %12 = arith.truncf %9 : vector<128x128xf32> to vector<128x128xbf16>
    %cst_10 = arith.constant dense<0.000000e+00> : vector<128x128xf32>
    %13 = tpu.matmul %12, %10, %cst_10 {dimension_numbers = #tpu.dot_dimension_numbers<[1], [0], [0], [1], [0, 0, 1, 1], [], []>} : vector<128x128xbf16>, vector<128x128xbf16>, vector<128x128xf32> -> vector<128x128xf32>
    %14 = vector.broadcast %11 : vector<1x128xf32> to vector<128x128xf32>
    %15 = arith.addf %13, %14 : vector<128x128xf32>
    %cst_11 = arith.constant 0.00999999977 : f32
    %16 = vector.broadcast %cst_11 : f32 to vector<128x128xf32>
    %17 = arith.mulf %16, %15 : vector<128x128xf32>
    %18 = arith.maximumf %15, %17 : vector<128x128xf32>
    %c0_12 = arith.constant 0 : index
    %c0_13 = arith.constant 0 : index
    %19 = vector.load %arg6[%c0_12, %c0_13] : memref<128x128xbf16, #tpu.memory_space<vmem>>, vector<128x128xbf16>
    %c0_14 = arith.constant 0 : index
    %c0_15 = arith.constant 0 : index
    %20 = vector.load %arg7[%c0_14, %c0_15] : memref<1x128xf32, #tpu.memory_space<vmem>>, vector<1x128xf32>
    %21 = arith.truncf %18 : vector<128x128xf32> to vector<128x128xbf16>
    %cst_16 = arith.constant dense<0.000000e+00> : vector<128x128xf32>
    %22 = tpu.matmul %21, %19, %cst_16 {dimension_numbers = #tpu.dot_dimension_numbers<[1], [0], [0], [1], [0, 0, 1, 1], [], []>} : vector<128x128xbf16>, vector<128x128xbf16>, vector<128x128xf32> -> vector<128x128xf32>
    %23 = vector.broadcast %20 : vector<1x128xf32> to vector<128x128xf32>
    %24 = arith.addf %22, %23 : vector<128x128xf32>
    %c0_17 = arith.constant 0 : index
    %c0_18 = arith.constant 0 : index
    %25 = vector.load %arg8[%c0_17, %c0_18] : memref<128x128xf32, #tpu.memory_space<vmem>>, vector<128x128xf32>
    tpu.vector_store %arg8[%c0_17, %c0_18], %24 {strides = array<i32>} : memref<128x128xf32, #tpu.memory_space<vmem>>, vector<128x128xf32>,
    return
  }
  func.func @transform_0(%arg0: i32) -> (i32, i32) {
    %c0_i32 = arith.constant 0 : i32
    %c0_i32_0 = arith.constant 0 : i32
    return %arg0, %c0_i32 : i32, i32
  }
  func.func @transform_1(%arg0: i32) -> (i32, i32) {
    %c0_i32 = arith.constant 0 : i32
    %c0_i32_0 = arith.constant 0 : i32
    %c0_i32_1 = arith.constant 0 : i32
    return %c0_i32, %c0_i32_0 : i32, i32
  }
  func.func @transform_2(%arg0: i32) -> (i32, i32) {
    %c0_i32 = arith.constant 0 : i32
    %c0_i32_0 = arith.constant 0 : i32
    %c0_i32_1 = arith.constant 0 : i32
    return %c0_i32, %c0_i32_0 : i32, i32
  }
  func.func @transform_3(%arg0: i32) -> (i32, i32) {
    %c0_i32 = arith.constant 0 : i32
    %c0_i32_0 = arith.constant 0 : i32
    %c0_i32_1 = arith.constant 0 : i32
    return %c0_i32, %c0_i32_0 : i32, i32
  }
  func.func @transform_4(%arg0: i32) -> (i32, i32) {
    %c0_i32 = arith.constant 0 : i32
    %c0_i32_0 = arith.constant 0 : i32
    %c0_i32_1 = arith.constant 0 : i32
    return %c0_i32, %c0_i32_0 : i32, i32
  }
  func.func @transform_5(%arg0: i32) -> (i32, i32) {
    %c0_i32 = arith.constant 0 : i32
    %c0_i32_0 = arith.constant 0 : i32
    %c0_i32_1 = arith.constant 0 : i32
    return %c0_i32, %c0_i32_0 : i32, i32
  }
  func.func @transform_6(%arg0: i32) -> (i32, i32) {
    %c0_i32 = arith.constant 0 : i32
    %c0_i32_0 = arith.constant 0 : i32
    %c0_i32_1 = arith.constant 0 : i32
    return %c0_i32, %c0_i32_0 : i32, i32
  }
  func.func @transform_7(%arg0: i32) -> (i32, i32) {
    %c0_i32 = arith.constant 0 : i32
    %c0_i32_0 = arith.constant 0 : i32
    return %arg0, %c0_i32 : i32, i32
  }
}

</mosaic_0001>

<bundles_post_ra>
// kernel: tpu_custom_call.1
= control target key start
LH: loop header
LB: loop body
LE: loop exit
PB: predicated region body
PF: predicated region fallthrough
CT: control target
= control target key end

     0   :  { %12 = vsyncpa [#allocation3], 0  ;;  %s1539_s0 = inlined_call_operand.vmem [shape: f32[512,32], index: 0, kind: input, shape index: {}]   ;;  %s1540_s1 = inlined_call_operand.vmem [shape: bf16[32,128], index: 1, kind: input, shape index: {}]   ;;  %s1541_s2 = inlined_call_operand.vmem [shape: f32[1,128], index: 2, kind: input, shape index: {}]   ;;  %s1542_s3 = inlined_call_operand.vmem [shape: bf16[128,128], index: 3, kind: input, shape index: {}]   ;;  %s1543_s4 = inlined_call_operand.vmem [shape: f32[1,128], index: 4, kind: input, shape index: {}]   ;;  %s1544_s5 = inlined_call_operand.vmem [shape: bf16[128,128], index: 5, kind: input, shape index: {}]   ;;  %s1545_s6 = inlined_call_operand.vmem [shape: f32[1,128], index: 6, kind: input, shape index: {}]   ;;  %s1546_s7 = inlined_call_operand.hbm [shape: f32[512,128], index: 7, kind: output, shape index: {}]  }
   0x1   :  { %14 = vsyncpa [#allocation3 + $0x1], 0  ;;  %s1290_s24 = smov 0   ;;  %s1292_s25 = smov 0  }
   0x2   :  { %s1294_s26 = smov 0   ;;  %s1296_s27 = smov 0  }
   0x3 LB: > { %s1311_s28 = sadd.s32 4294967295, %s1245_s27   ;;  %s958_s29 = sadd.s32 4294967294, %s1245_s27   ;;  %s1245_s27 = sphi %s1296_s27, %s1552_s27   ;;  %s1241_s26 = sphi %s1294_s26, %s1551_s26   ;;  %s1237_s25 = sphi %s1292_s25, %s1550_s25   ;;  %s1233_s24 = sphi %s1290_s24, %s1549_s24  }
   0x4   : > { %s1315_s30 = sadd.s32 1, %s1245_s27   ;;  %s179_s8 = sadd.s32 1, %s1241_s26 }
   0x5   : > { %s176_s9 = ssub.s32 %s1245_s27, %s1315_s30  ;;  %p189_p0 = scmp.ne.s32.totalorder %s1241_s26, %s1237_s25 }
   0x6   : > { %p177_p1 = scmp.eq.s32.totalorder %s176_s9, 0  ;;  %p190_p2 = scmp.eq.s32.totalorder %s1311_s28, 3 }
   0x7   : > { %p195_p3 = scmp.ne.s32.totalorder %s1237_s25, %s1233_s24  ;;  %p196_p4 = scmp.eq.s32.totalorder %s958_s29, 3 }
   0x8   : > { %s1326_s10 = scalar_select %p177_p1, %s1241_s26, %s179_s8  }
   0x9   : > { %p1328_p5 = por %p190_p2, %p189_p0  ;;  %p1332_p6 = por %p196_p4, %p195_p3 }
   0xa   : > { %p961_p7 = scmp.ge.s32.totalorder %s1245_s27, 1  ;;  %p241_p8 = scmp.lt.s32.totalorder %s1245_s27, 5 }
   0xc   : > { %p242_p9 = pnand %p961_p7, %p241_p8 }
   0xd   : > { %s963_s15 = sshll.u32 (!%p242_p9), %s1311_s28, 4  ;;  %s270_s16 = sand.u32 (!%p242_p9), 1, %s1237_s25  }
   0xe   : > { %245 = sbr.rel (%p242_p9) target bundleno = 683 (0x2ab), region = 48  ;;  %p274_p10 = scmp.lt.s32.totalorder (!%p242_p9), %s963_s15, 63 }
   0xf   : > { %s962_s17 = sshll.u32 (!%p242_p9), %s270_s16, 7  ;;  %s999_s21 = sshll.u32 (!%p242_p9), %s1311_s28, 11 }
  0x10   : > { %s1470_s20 = scalar_lea.vmem (!%p242_p9), [#allocation2], %s962_s17  ;;  %s1491_s8 = scalar_lea.hbm (!%p242_p9), %s1546_s7, %s999_s21 }
  0x11   : > { %s1499_s28 = scalar_lea.sflag (!%p242_p9), [#allocation3], %s270_s16 }
  0x13   : > { %v1167_v0 = vld [vmem:[%s1540_s1 + $0x8] sm:$0xff]   ;;  %v1168_v1 = vld [vmem:[%s1540_s1] sm:$0xff]   ;;  %v1169_v2 = vld [vmem:[%s1542_s3 + $0x38] sm:$0xff]   ;;  %s1554_s15 = smov (!%p274_p10, %s963_s15), 63  ;;  %vm328_vm0 = vcmask 261120  }
  0x14   : > { %1042 = vmatprep.subr.bf16.mxu0 %v1167_v0  ;;  %v1170_v3 = vld [vmem:[%s1542_s3 + $0x30] sm:$0xff]   ;;  %1062 = vmatprep.subr.bf16.mxu1 %v1169_v2  ;;  %s964_s22 = sshll.u32 %s1554_s15, 3  ;;  %v1171_v4 = vld [vmem:[%s1542_s3 + $0x28] sm:$0xff]   ;;  %v1172_v14 = vld [vmem:[%s1542_s3 + $0x20] sm:$0xff]  }
  0x15   : > { %1043 = vmatpush3.bf16.msra.mxu0 %v1167_v0  ;;  %1063 = vmatpush3.bf16.msra.mxu1 %v1169_v2  ;;  %s1357_s13 = scalar_lea.vmem %s1539_s0, %s964_s22  ;;  %v1173_v30 = vld [vmem:[%s1542_s3 + $0x18] sm:$0xff]   ;;  %v1174_v31 = vld [vmem:[%s1542_s3 + $0x10] sm:$0xff]   ;;  %v1175_v32 = vld [vmem:[%s1542_s3 + $0x8] sm:$0xff]   ;;  %s896_s22 = sshll.u32 %s1470_s20, 4  ;;  %s1493_s22 = int_to_ptr.vmem [resolvable:$true] %s896_s22 }
  0x16   : > { %1044 = vmatprep.subr.bf16.mxu0 %v1168_v1  ;;  %1064 = vmatprep.subr.bf16.mxu1 %v1170_v3  ;;  %v281_v5 = vld [vmem:[%s1357_s13] sm:$0xff]  ;;  %v282_v6 = vld [vmem:[%s1357_s13 + $0x8] sm:$0xff]  ;;  %v283_v7 = vld [vmem:[%s1357_s13 + $0x10] sm:$0xff]  ;;  %s1185_s9 = scalar_lea.vmem %s1493_s22, 2048 }
  0x17   : > { %v302_v8 = vpack.c.bf16 %v282_v6, %v281_v5  ;;  %v284_v9 = vld [vmem:[%s1357_s13 + $0x18] sm:$0xff]  ;;  %v285_v10 = vld [vmem:[%s1357_s13 + $0x20] sm:$0xff]  ;;  %v286_v11 = vld [vmem:[%s1357_s13 + $0x28] sm:$0xff]  ;;  %p1186_p11 = scmp.ne.s32.totalorder %s1493_s22, %s1185_s9 }
  0x18   : > { %v303_v12 = vpack.c.bf16 %v284_v9, %v283_v7  ;;  %v304_v13 = vpack.c.bf16 %v286_v11, %v285_v10  ;;  %v287_v15 = vld [vmem:[%s1357_s13 + $0x30] sm:$0xff]  ;;  %v288_v16 = vld [vmem:[%s1357_s13 + $0x38] sm:$0xff]  ;;  %v289_v17 = vld [vmem:[%s1357_s13 + $0x40] sm:$0xff] }
  0x19   : > { %1045 = vmatpush3.bf16.msra.mxu0 %v1168_v1  ;;  %1065 = vmatpush3.bf16.msra.mxu1 %v1170_v3  ;;  %v290_v18 = vld [vmem:[%s1357_s13 + $0x48] sm:$0xff]  ;;  %v305_v19 = vpack.c.bf16 %v288_v16, %v287_v15  ;;  %v291_v21 = vld [vmem:[%s1357_s13 + $0x50] sm:$0xff]  ;;  %v292_v22 = vld [vmem:[%s1357_s13 + $0x58] sm:$0xff]  ;;  %p1187_p12 = pnand %p1186_p11, %p1328_p5 }
  0x1a   : > { %1046 = vmatprep.mubr.msk.bf16.mxu0 %vm328_vm0, %v302_v8  ;;  %1066 = vmatprep.subr.bf16.mxu1 %v1171_v4  ;;  %v306_v20 = vpack.c.bf16 %v290_v18, %v289_v17  ;;  %v293_v23 = vld [vmem:[%s1357_s13 + $0x60] sm:$0xff]  ;;  %v294_v24 = vld [vmem:[%s1357_s13 + $0x68] sm:$0xff]  ;;  %v307_v25 = vpack.c.bf16 %v292_v22, %v291_v21  ;;  %v295_v27 = vld [vmem:[%s1357_s13 + $0x70] sm:$0xff] }
  0x1b   : > { %v308_v26 = vpack.c.bf16 %v294_v24, %v293_v23  ;;  %v296_v28 = vld [vmem:[%s1357_s13 + $0x78] sm:$0xff]  ;;  %v1176_v33 = vld [vmem:[%s1542_s3] sm:$0xff]   ;;  %v1178_v35 = vld [vmem:[%s1544_s5 + $0x30] sm:$0xff]   ;;  %p1188_p13 = pneg %p1187_p12  ;;  %s1247_s13 = smov [#allocation2]  }
  0x1c   : > { %1047 = vmatmul.mubr.msk.bf16.vlgmr.msra.gmra.mxu0 %vm328_vm0, %v303_v12  ;;  %v309_v29 = vpack.c.bf16 %v296_v28, %v295_v27  ;;  %v1177_v34 = vld [vmem:[%s1544_s5 + $0x38] sm:$0xff]   ;;  %v1179_v36 = vld [vmem:[%s1544_s5 + $0x28] sm:$0xff]   ;;  %v1180_v37 = vld [vmem:[%s1544_s5 + $0x20] sm:$0xff]   ;;  %s1189_s14 = sshll.u32 %s1247_s13, 4  ;;  %s1190_s14 = int_to_ptr.vmem [resolvable:$false] %s1189_s14 }
  0x1d   : > { %1050 = vmatprep.mubr.msk.bf16.mxu0 %vm328_vm0, %v304_v13  ;;  %1067 = vmatpush3.bf16.msra.mxu1 %v1171_v4  ;;  %v1181_v38 = vld [vmem:[%s1544_s5 + $0x18] sm:$0xff]   ;;  %v1416_v40 = vld [vmem:[%s1541_s2] ss:$0 sm:$0xff]  ;;  %s1191_s15 = scalar_lea.vmem %s1190_s14, 4096  ;;  %p1192_p0 = scmp.lt.s32.totalorder %s1493_s22, %s1190_s14 }
  0x1e   : > { %1068 = vmatprep.subr.bf16.mxu1 %v1172_v14  ;;  %1094 = vmatprep.subr.bf16.mxu0 %v1177_v34  ;;  %p1193_p1 = scmp.lt.s32.totalorder %s1191_s15, %s1185_s9 }
  0x1f   : > { %1095 = vmatpush3.bf16.msra.mxu0 %v1177_v34 }
  0x20   : > { %1096 = vmatprep.subr.bf16.mxu0 %v1178_v35  ;;  %p1194_p2 = por %p1193_p1, %p1192_p0 }
  0x21   : > { %1069 = vmatpush3.bf16.msra.mxu1 %v1172_v14 }
  0x22   : > { %1070 = vmatprep.subr.bf16.mxu1 %v1173_v30  ;;  %p1195_p3 = pnand %p1194_p2, %p1188_p13 }
  0x23   : > { %1097 = vmatpush3.bf16.msra.mxu0 %v1178_v35 }
  0x24   : > { %1051 = vmatmul.mubr.msk.bf16.gmra.mxu0 %vm328_vm0, %v305_v19  ;;  %1098 = vmatprep.subr.bf16.mxu0 %v1179_v36 }
  0x25   : > { %1054 = vmatprep.mubr.msk.bf16.mxu0 %vm328_vm0, %v306_v20  ;;  %1071 = vmatpush3.bf16.msra.mxu1 %v1173_v30 }
  0x26   : > { %1072 = vmatprep.subr.bf16.mxu1 %v1174_v31 }
  0x27   : > { %1099 = vmatpush3.bf16.msra.mxu0 %v1179_v36 }
  0x28   : > { %1100 = vmatprep.subr.bf16.mxu0 %v1180_v37 }
  0x29   : > { %1073 = vmatpush3.bf16.msra.mxu1 %v1174_v31 }
  0x2a   : > { %1074 = vmatprep.subr.bf16.mxu1 %v1175_v32 }
  0x2b   : > { %1101 = vmatpush3.bf16.msra.mxu0 %v1180_v37 }
  0x2c   : > { %1055 = vmatmul.mubr.msk.bf16.gmra.mxu0 %vm328_vm0, %v307_v25  ;;  %1102 = vmatprep.subr.bf16.mxu0 %v1181_v38 }
  0x2d   : > { %1058 = vmatprep.mubr.msk.bf16.mxu0 %vm328_vm0, %v308_v26  ;;  %1075 = vmatpush3.bf16.msra.mxu1 %v1175_v32 }
  0x2e   : > { %1076 = vmatprep.subr.bf16.mxu1 %v1176_v33 }
  0x2f   : > { %1103 = vmatpush3.bf16.msra.mxu0 %v1181_v38 }
  0x31   : > { %1077 = vmatpush3.bf16.msra.mxu1 %v1176_v33 }
  0x34   : > { %1059 = vmatmul.mubr.msk.bf16.gmra.mxu0 %vm328_vm0, %v309_v29 }
  0xdc   : > { %v1048_v39 = vpop.f32.mrf.mxu0 }
  0xdd   : > { %v396_v43 = vadd.f32 %v1048_v39, %v1416_v40 }
  0xde   : > { %v387_v41 = vpop.f32.mrf.mxu0 }
  0xdf   : > { %v388_v42 = vadd.f32 %v1416_v40, %v387_v41  ;;  %v452_v50 = vmul.f32 0.01, %v396_v43 }
  0xe0   : > { %v1049_v44 = vpop.f32.mrf.mxu0 }
  0xe1   : > { %v399_v45 = vadd.f32 %v1049_v44, %v1416_v40  ;;  %v450_v47 = vmul.f32 0.01, %v388_v42  ;;  %v468_v58 = vmax.f32 %v396_v43, %v452_v50  ;;  %v1184_v50 = vld [vmem:[%s1544_s5] sm:$0xff]  }
  0xe2   : > { %v390_v46 = vpop.f32.mrf.mxu0 }
  0xe3   : > { %v453_v48 = vmul.f32 0.01, %v399_v45  ;;  %v391_v49 = vadd.f32 %v1416_v40, %v390_v46  ;;  %v466_v56 = vmax.f32 %v388_v42, %v450_v47 }
  0xe4   : > { %v1052_v51 = vpop.f32.mrf.mxu0 }
  0xe5   : > { %v451_v52 = vmul.f32 0.01, %v391_v49  ;;  %v469_v53 = vmax.f32 %v399_v45, %v453_v48  ;;  %v412_v59 = vadd.f32 %v1052_v51, %v1416_v40 }
  0xe6   : > { %v403_v54 = vpop.f32.mrf.mxu0 }
  0xe7   : > { %v404_v55 = vadd.f32 %v1416_v40, %v403_v54  ;;  %v467_v57 = vmax.f32 %v391_v49, %v451_v52  ;;  %v500_v0 = vpack.c.bf16 %v469_v53, %v468_v58  ;;  %v456_v4 = vmul.f32 0.01, %v412_v59  ;;  %v1182_v49 = vld [vmem:[%s1544_s5 + $0x10] sm:$0xff]   ;;  %v1446_v52 = vld [vmem:[%s1543_s4] ss:$0 sm:$0xff] }
  0xe8   : > { %v1053_v60 = vpop.f32.mrf.mxu0  ;;  %1104 = vmatprep.subr.bf16.mxu0 %v1182_v49 }
  0xe9   : > { %v415_v61 = vadd.f32 %v1053_v60, %v1416_v40  ;;  %v499_v62 = vpack.c.bf16 %v467_v57, %v466_v56  ;;  %v454_v1 = vmul.f32 0.01, %v404_v55  ;;  %v472_v12 = vmax.f32 %v412_v59, %v456_v4  ;;  %1105 = vmatpush3.bf16.msra.mxu0 %v1182_v49 }
  0xea   : > { %v406_v63 = vpop.f32.mrf.mxu0 }
  0xeb   : > { %v457_v2 = vmul.f32 0.01, %v415_v61  ;;  %v407_v3 = vadd.f32 %v1416_v40, %v406_v63  ;;  %1078 = vmatprep.mubr.bf16.mxu1 %v499_v62  ;;  %v470_v9 = vmax.f32 %v404_v55, %v454_v1 }
  0xec   : > { %v1056_v5 = vpop.f32.mrf.mxu0  ;;  %1079 = vmatmul.mubr.bf16.vlgmr.msra.gmra.mxu1 %v500_v0 }
  0xed   : > { %v455_v6 = vmul.f32 0.01, %v407_v3  ;;  %v473_v7 = vmax.f32 %v415_v61, %v457_v2  ;;  %v428_v13 = vadd.f32 %v1056_v5, %v1416_v40 }
  0xee   : > { %v419_v8 = vpop.f32.mrf.mxu0 }
  0xef   : > { %v471_v10 = vmax.f32 %v407_v3, %v455_v6  ;;  %v420_v11 = vadd.f32 %v1416_v40, %v419_v8  ;;  %v502_v18 = vpack.c.bf16 %v473_v7, %v472_v12  ;;  %v460_v22 = vmul.f32 0.01, %v428_v13 }
  0xf0   : > { %v1057_v14 = vpop.f32.mrf.mxu0 }
  0xf1   : > { %v431_v15 = vadd.f32 %v1057_v14, %v1416_v40  ;;  %v501_v16 = vpack.c.bf16 %v471_v10, %v470_v9  ;;  %v458_v19 = vmul.f32 0.01, %v420_v11  ;;  %v476_v30 = vmax.f32 %v428_v13, %v460_v22 }
  0xf2   : > { %v422_v17 = vpop.f32.mrf.mxu0 }
  0xf3   : > { %v461_v20 = vmul.f32 0.01, %v431_v15  ;;  %v423_v21 = vadd.f32 %v1416_v40, %v422_v17  ;;  %1082 = vmatprep.mubr.bf16.mxu1 %v501_v16  ;;  %v474_v27 = vmax.f32 %v420_v11, %v458_v19 }
  0xf4   : > { %v1060_v23 = vpop.f32.mrf.mxu0  ;;  %1083 = vmatmul.mubr.bf16.gmra.mxu1 %v502_v18 }
  0xf5   : > { %v459_v24 = vmul.f32 0.01, %v423_v21  ;;  %v477_v25 = vmax.f32 %v431_v15, %v461_v20  ;;  %v444_v31 = vadd.f32 %v1060_v23, %v1416_v40 }
  0xf6   : > { %v435_v26 = vpop.f32.mrf.mxu0 }
  0xf7   : > { %v475_v28 = vmax.f32 %v423_v21, %v459_v24  ;;  %v436_v29 = vadd.f32 %v1416_v40, %v435_v26  ;;  %v504_v36 = vpack.c.bf16 %v477_v25, %v476_v30  ;;  %v464_v41 = vmul.f32 0.01, %v444_v31 }
  0xf8   : > { %v1061_v32 = vpop.f32.mrf.mxu0 }
  0xf9   : > { %v447_v33 = vadd.f32 %v1061_v32, %v1416_v40  ;;  %v503_v34 = vpack.c.bf16 %v475_v28, %v474_v27  ;;  %v462_v37 = vmul.f32 0.01, %v436_v29  ;;  %v480_v46 = vmax.f32 %v444_v31, %v464_v41 }
  0xfa   : > { %v438_v35 = vpop.f32.mrf.mxu0 }
  0xfb   : > { %v465_v38 = vmul.f32 0.01, %v447_v33  ;;  %v439_v39 = vadd.f32 %v1416_v40, %v438_v35  ;;  %1086 = vmatprep.mubr.bf16.mxu1 %v503_v34  ;;  %v478_v44 = vmax.f32 %v436_v29, %v462_v37  ;;  %v1183_v40 = vld [vmem:[%s1544_s5 + $0x8] sm:$0xff]  }
  0xfc   : > { %1087 = vmatmul.mubr.bf16.gmra.mxu1 %v504_v36  ;;  %1106 = vmatprep.subr.bf16.mxu0 %v1183_v40 }
  0xfd   : > { %v463_v42 = vmul.f32 0.01, %v439_v39  ;;  %v481_v43 = vmax.f32 %v447_v33, %v465_v38  ;;  %1107 = vmatpush3.bf16.msra.mxu0 %v1183_v40 }
  0xfe   : > { %1108 = vmatprep.subr.bf16.mxu0 %v1184_v50 }
  0xff   : > { %v479_v45 = vmax.f32 %v439_v39, %v463_v42  ;;  %v506_v48 = vpack.c.bf16 %v481_v43, %v480_v46 }
 0x101   : > { %v505_v47 = vpack.c.bf16 %v479_v45, %v478_v44  ;;  %1109 = vmatpush3.bf16.msra.mxu0 %v1184_v50 }
 0x103   : > { %1090 = vmatprep.mubr.bf16.mxu1 %v505_v47 }
 0x104   : > { %1091 = vmatmul.mubr.bf16.gmra.mxu1 %v506_v48 }
 0x1ac   : > { %v1080_v51 = vpop.f32.mrf.mxu1 }
 0x1ad   : > { %v604_v55 = vadd.f32 %v1080_v51, %v1446_v52 }
 0x1ae   : > { %v595_v53 = vpop.f32.mrf.mxu1 }
 0x1af   : > { %v596_v54 = vadd.f32 %v1446_v52, %v595_v53  ;;  %v660_v62 = vmul.f32 0.01, %v604_v55 }
 0x1b0   : > { %v1081_v56 = vpop.f32.mrf.mxu1 }
 0x1b1   : > { %v607_v57 = vadd.f32 %v1081_v56, %v1446_v52  ;;  %v658_v59 = vmul.f32 0.01, %v596_v54  ;;  %v676_v6 = vmax.f32 %v604_v55, %v660_v62 }
 0x1b2   : > { %v598_v58 = vpop.f32.mrf.mxu1 }
 0x1b3   : > { %v661_v60 = vmul.f32 0.01, %v607_v57  ;;  %v599_v61 = vadd.f32 %v1446_v52, %v598_v58  ;;  %v674_v3 = vmax.f32 %v596_v54, %v658_v59 }
 0x1b4   : > { %v1084_v63 = vpop.f32.mrf.mxu1 }
 0x1b5   : > { %v659_v0 = vmul.f32 0.01, %v599_v61  ;;  %v677_v1 = vmax.f32 %v607_v57, %v661_v60  ;;  %v620_v7 = vadd.f32 %v1084_v63, %v1446_v52 }
 0x1b6   : > { %v611_v2 = vpop.f32.mrf.mxu1 }
 0x1b7   : > { %v675_v4 = vmax.f32 %v599_v61, %v659_v0  ;;  %v612_v5 = vadd.f32 %v1446_v52, %v611_v2  ;;  %v708_v11 = vpack.c.bf16 %v677_v1, %v676_v6  ;;  %v664_v16 = vmul.f32 0.01, %v620_v7  ;;  %v985_v61 = vld [vmem:[%s1545_s6] ss:$0 sm:$0xff] }
 0x1b8   : > { %v1085_v8 = vpop.f32.mrf.mxu1 }
 0x1b9   : > { %v623_v9 = vadd.f32 %v1085_v8, %v1446_v52  ;;  %v707_v10 = vpack.c.bf16 %v675_v4, %v674_v3  ;;  %v662_v13 = vmul.f32 0.01, %v612_v5  ;;  %v680_v24 = vmax.f32 %v620_v7, %v664_v16 }
 0x1ba   : > { %v614_v12 = vpop.f32.mrf.mxu1 }
 0x1bb   : > { %v665_v14 = vmul.f32 0.01, %v623_v9  ;;  %v615_v15 = vadd.f32 %v1446_v52, %v614_v12  ;;  %1110 = vmatprep.mubr.bf16.mxu0 %v707_v10  ;;  %v678_v21 = vmax.f32 %v612_v5, %v662_v13 }
 0x1bc   : > { %v1088_v17 = vpop.f32.mrf.mxu1  ;;  %1111 = vmatmul.mubr.bf16.vlgmr.msra.gmra.mxu0 %v708_v11 }
 0x1bd   : > { %v663_v18 = vmul.f32 0.01, %v615_v15  ;;  %v681_v19 = vmax.f32 %v623_v9, %v665_v14  ;;  %v636_v25 = vadd.f32 %v1088_v17, %v1446_v52 }
 0x1be   : > { %v627_v20 = vpop.f32.mrf.mxu1 }
 0x1bf   : > { %v679_v22 = vmax.f32 %v615_v15, %v663_v18  ;;  %v628_v23 = vadd.f32 %v1446_v52, %v627_v20  ;;  %v710_v30 = vpack.c.bf16 %v681_v19, %v680_v24  ;;  %v668_v34 = vmul.f32 0.01, %v636_v25 }
 0x1c0   : > { %v1089_v26 = vpop.f32.mrf.mxu1 }
 0x1c1   : > { %v639_v27 = vadd.f32 %v1089_v26, %v1446_v52  ;;  %v709_v28 = vpack.c.bf16 %v679_v22, %v678_v21  ;;  %v666_v31 = vmul.f32 0.01, %v628_v23  ;;  %v684_v43 = vmax.f32 %v636_v25, %v668_v34 }
 0x1c2   : > { %v630_v29 = vpop.f32.mrf.mxu1 }
 0x1c3   : > { %v669_v32 = vmul.f32 0.01, %v639_v27  ;;  %v631_v33 = vadd.f32 %v1446_v52, %v630_v29  ;;  %1114 = vmatprep.mubr.bf16.mxu0 %v709_v28  ;;  %v682_v39 = vmax.f32 %v628_v23, %v666_v31 }
 0x1c4   : > { %v1092_v35 = vpop.f32.mrf.mxu1  ;;  %1115 = vmatmul.mubr.bf16.gmra.mxu0 %v710_v30 }
 0x1c5   : > { %v667_v36 = vmul.f32 0.01, %v631_v33  ;;  %v685_v37 = vmax.f32 %v639_v27, %v669_v32  ;;  %v652_v44 = vadd.f32 %v1092_v35, %v1446_v52 }
 0x1c6   : > { %v643_v38 = vpop.f32.mrf.mxu1 }
 0x1c7   : > { %v683_v41 = vmax.f32 %v631_v33, %v667_v36  ;;  %v644_v42 = vadd.f32 %v1446_v52, %v643_v38  ;;  %v712_v49 = vpack.c.bf16 %v685_v37, %v684_v43  ;;  %v672_v53 = vmul.f32 0.01, %v652_v44 }
 0x1c8   : > { %v1093_v45 = vpop.f32.mrf.mxu1 }
 0x1c9   : > { %v655_v46 = vadd.f32 %v1093_v45, %v1446_v52  ;;  %v711_v47 = vpack.c.bf16 %v683_v41, %v682_v39  ;;  %v670_v40 = vmul.f32 0.01, %v644_v42  ;;  %v688_v58 = vmax.f32 %v652_v44, %v672_v53 }
 0x1ca   : > { %v646_v48 = vpop.f32.mrf.mxu1 }
 0x1cb   : > { %v673_v50 = vmul.f32 0.01, %v655_v46  ;;  %v647_v51 = vadd.f32 %v1446_v52, %v646_v48  ;;  %1118 = vmatprep.mubr.bf16.mxu0 %v711_v47  ;;  %v686_v56 = vmax.f32 %v644_v42, %v670_v40 }
 0x1cc   : > { %1119 = vmatmul.mubr.bf16.gmra.mxu0 %v712_v49 }
 0x1cd   : > { %v671_v54 = vmul.f32 0.01, %v647_v51  ;;  %v689_v55 = vmax.f32 %v655_v46, %v673_v50 }
 0x1cf   : > { %v687_v57 = vmax.f32 %v647_v51, %v671_v54  ;;  %v714_v60 = vpack.c.bf16 %v689_v55, %v688_v58 }
 0x1d1   : > { %v713_v59 = vpack.c.bf16 %v687_v57, %v686_v56 }
 0x1d3   : > { %1122 = vmatprep.mubr.bf16.mxu0 %v713_v59 }
 0x1d4   : > { %1123 = vmatmul.mubr.bf16.gmra.mxu0 %v714_v60 }
 0x27c   : > { %v1112_v52 = vpop.f32.mrf.mxu0 }
 0x27d   : > { %v812_v62 = vadd.f32 %v1112_v52, %v985_v61 }
 0x27e   : > { %v803_v63 = vpop.f32.mrf.mxu0 }
 0x27f   : > { %868 = vst [vmem:[%s1470_s20 + $0x10] sm:$0xff] %v812_v62  ;;  %v804_v0 = vadd.f32 %v985_v61, %v803_v63 }
 0x280   : > { %v1113_v1 = vpop.f32.mrf.mxu0 }
 0x281   : > { %866 = vst [vmem:[%s1470_s20] sm:$0xff] %v804_v0  ;;  %v815_v2 = vadd.f32 %v1113_v1, %v985_v61 }
 0x282   : > { %v806_v3 = vpop.f32.mrf.mxu0 }
 0x283   : > { %869 = vst [vmem:[%s1470_s20 + $0x18] sm:$0xff] %v815_v2  ;;  %v807_v4 = vadd.f32 %v985_v61, %v806_v3 }
 0x284   : > { %v1116_v5 = vpop.f32.mrf.mxu0 }
 0x285   : > { %867 = vst [vmem:[%s1470_s20 + $0x8] sm:$0xff] %v807_v4  ;;  %v828_v6 = vadd.f32 %v1116_v5, %v985_v61 }
 0x286   : > { %v819_v7 = vpop.f32.mrf.mxu0 }
 0x287   : > { %872 = vst [vmem:[%s1470_s20 + $0x30] sm:$0xff] %v828_v6  ;;  %v820_v8 = vadd.f32 %v985_v61, %v819_v7 }
 0x288   : > { %v1117_v9 = vpop.f32.mrf.mxu0 }
 0x289   : > { %870 = vst [vmem:[%s1470_s20 + $0x20] sm:$0xff] %v820_v8  ;;  %v831_v10 = vadd.f32 %v1117_v9, %v985_v61 }
 0x28a   : > { %v822_v11 = vpop.f32.mrf.mxu0 }
 0x28b   : > { %873 = vst [vmem:[%s1470_s20 + $0x38] sm:$0xff] %v831_v10  ;;  %v823_v12 = vadd.f32 %v985_v61, %v822_v11 }
 0x28c   : > { %v1120_v13 = vpop.f32.mrf.mxu0 }
 0x28d   : > { %871 = vst [vmem:[%s1470_s20 + $0x28] sm:$0xff] %v823_v12  ;;  %v844_v14 = vadd.f32 %v1120_v13, %v985_v61 }
 0x28e   : > { %v835_v15 = vpop.f32.mrf.mxu0 }
 0x28f   : > { %876 = vst [vmem:[%s1470_s20 + $0x50] sm:$0xff] %v844_v14  ;;  %v836_v16 = vadd.f32 %v985_v61, %v835_v15 }
 0x290   : > { %v1121_v17 = vpop.f32.mrf.mxu0 }
 0x291   : > { %874 = vst [vmem:[%s1470_s20 + $0x40] sm:$0xff] %v836_v16  ;;  %v847_v18 = vadd.f32 %v1121_v17, %v985_v61 }
 0x292   : > { %v838_v19 = vpop.f32.mrf.mxu0 }
 0x293   : > { %877 = vst [vmem:[%s1470_s20 + $0x58] sm:$0xff] %v847_v18  ;;  %v839_v20 = vadd.f32 %v985_v61, %v838_v19 }
 0x294   : > { %v1124_v21 = vpop.f32.mrf.mxu0 }
 0x295   : > { %875 = vst [vmem:[%s1470_s20 + $0x48] sm:$0xff] %v839_v20  ;;  %v860_v22 = vadd.f32 %v1124_v21, %v985_v61 }
 0x296   : > { %v851_v23 = vpop.f32.mrf.mxu0 }
 0x297   : > { %880 = vst [vmem:[%s1470_s20 + $0x70] sm:$0xff] %v860_v22  ;;  %v852_v24 = vadd.f32 %v985_v61, %v851_v23 }
 0x298   : > { %v1125_v25 = vpop.f32.mrf.mxu0 }
 0x299   : > { %878 = vst [vmem:[%s1470_s20 + $0x60] sm:$0xff] %v852_v24  ;;  %v863_v26 = vadd.f32 %v1125_v25, %v985_v61 }
 0x29a   : > { %v854_v27 = vpop.f32.mrf.mxu0 }
 0x29b   : > { %881 = vst [vmem:[%s1470_s20 + $0x78] sm:$0xff] %v863_v26  ;;  %v855_v28 = vadd.f32 %v985_v61, %v854_v27 }
 0x29d   : > { %879 = vst [vmem:[%s1470_s20 + $0x68] sm:$0xff] %v855_v28 }
 0x29e   : > { %1198 = shalt.err (!%p1195_p3)
}
 0x29f   : > { %s1199_s16 = scalar_lea.hbm %s1491_s8, 2048  ;;  %s1203_s19 = scalar_lea.hbm %s1546_s7, 8192 }
 0x2a0   : > { %p1200_p4 = scmp.ne.s32.totalorder %s1491_s8, %s1199_s16  ;;  %p1204_p9 = scmp.lt.s32.totalorder %s1491_s8, %s1546_s7 }
 0x2a1   : > { %p1205_p10 = scmp.lt.s32.totalorder %s1203_s19, %s1199_s16 }
 0x2a2   : > { %p1201_p7 = pnand %p1200_p4, %p1328_p5 }
 0x2a3   : > { %p1206_p11 = por %p1205_p10, %p1204_p9 }
 0x2a4   : > { %p1202_p8 = pneg %p1201_p7 }
 0x2a6   : > { %p1207_p12 = pnand %p1206_p11, %p1202_p8 }
 0x2a8   : > { %1210 = shalt.err (!%p1207_p12)
}
 0x2a9   : > { %s1248_s23 = smov 128   ;;  %s1249_s29 = smov 8  }
 0x2aa   : > { %1126 = dma.vmem_to_hbm [thread:$0]  (%p1328_p5), %s1493_s22, 2048, %s1491_s8, %s1499_s28, %s1248_s23, %s1248_s23, %s1249_s29  }
 0x2ab PF: > { %p1132_p13 = scmp.ge.s32.totalorder %s1245_s27, 2  ;;  %s911_s9 = sand.u32 1, %s1233_s24  }
 0x2ac   : > { %s912_s13 = scalar_lea.sflag [#allocation3], %s911_s9 }
 0x2ad   : > { %p1129_p0 = pnand %p1132_p13, %p1332_p6 }
 0x2af   : > { %p1130_p1 = pneg %p1129_p0 }
 0x2b1   : > { %1228 = dma.done.wait (%p1130_p1), %s912_s13, 2048  }
 0x2b2   : > { %1230 = vsyncadd (%p1130_p1), %s912_s13, 4294965248  ;;  %p17_p2 = scmp.ge.s32.totalorder %s1315_s30, 6   ;;  %s1549_s24 = smov %s1237_s25 }
 0x2b3   : > { %s1550_s25 = smov %s1241_s26  ;;  %s1551_s26 = smov %s1326_s10 }
 0x2b4   : > { %s1552_s27 = smov %s1315_s30  ;;  %19 = sbr.rel (!%p17_p2) target bundleno = 3 (0x3), region = 83 }
 0x2b9   :  { %917 = vsyncpa [#allocation3], 1 }
 0x2ba   :  { %919 = vsyncpa [#allocation3 + $0x1], 1 }

</bundles_post_ra>
